<compile_context>
chip_gen: v7x
topology: tpu7x:2x2x1
jax: 0.10.0
libtpu: 0.0.40
codegen_flags: <defaults>
</compile_context>

<pallas_src>
import functools

import jax
import jax.numpy as jnp
from jax.experimental import pallas as pl
from jax.experimental.pallas import tpu as pltpu

NR_CLASSES = 9               # ADDMNIST_DPL default
_DEFAULT_TILE_COLS = 65536   # (9, 65536) f32 tile ~= 2.25 MiB (VMEM-safe everywhere)
_SMALL_BATCH_FASTPATH = 16384


def _nll_mean_ref(ys, labels):
    """Plain-JAX NLL: F.nll_loss(ys.log(), labels) with mean reduction."""
    logp = jnp.log(ys.astype(jnp.float32))
    picked = jnp.take_along_axis(
        logp, labels[:, None].astype(jnp.int32), axis=-1)[:, 0]
    return -jnp.mean(picked)


def _dpl_nll_kernel(ys_ref, labels_ref, out_ref, acc_ref, *,
                    tiles_per_core, last_tile, tail_cols):
    """Class-major NLL partial-sum kernel.

    ys_ref:     (C, TB)  probabilities, native dtype (class-major, lane-dense)
    labels_ref: (1, TB)  int32 class indices in [0, C)
    out_ref:    (8, 128) f32 per-core partial sum of log p(label) (broadcast)
    acc_ref:    (C, TB)  f32 VMEM tile-shaped accumulator (per core)
    """
    c = pl.program_id(0)               # core shard
    i = pl.program_id(1)               # tile within this core's shard

    @pl.when(i == 0)
    def _init():
        acc_ref[...] = jnp.zeros_like(acc_ref)

    ys = ys_ref[...].astype(jnp.float32)        # upcast AFTER the (bf16) DMA
    labels = labels_ref[...]                    # (1, TB) int32
    cdim, tb = ys.shape

    # One-hot via sublane-iota == broadcast labels (no gather on TPU).
    class_ids = jax.lax.broadcasted_iota(jnp.int32, (cdim, tb), 0)
    onehot = class_ids == labels                # (C, TB) bool
    # Select form (NOT mask*log): unselected -inf/NaN entries are never read,
    # so zero probabilities and garbage in the padded tail stay harmless.
    logp = jnp.log(ys)

    if tail_cols == 0:
        # Every tile is full: no tail masking anywhere in the hot loop.
        acc_ref[...] += jnp.where(onehot, logp, 0.0)
    else:
        g = c * tiles_per_core + i              # global tile index (scalar, free)

        @pl.when(g < last_tile)                 # steady state: no tail mask
        def _steady():
            acc_ref[...] += jnp.where(onehot, logp, 0.0)

        @pl.when(g == last_tile)                # only the last tile pays for the tail
        def _tail():
            col_ids = jax.lax.broadcasted_iota(jnp.int32, (cdim, tb), 1)
            acc_ref[...] += jnp.where(onehot & (col_ids < tail_cols), logp, 0.0)

    @pl.when(i == pl.num_programs(1) - 1)
    def _finalize():
        # Single cross-lane reduce per core; 1/B scaling happens in the wrapper.
        out_ref[...] = jnp.full((8, 128), jnp.sum(acc_ref[...]), dtype=jnp.float32)


def addmnist_dpl_forward(out_dict, args=None, *, tile_cols=None, force_pallas=False):
    """JAX/Pallas equivalent of ADDMNIST_DPL.forward(out_dict, args)."""
    del args  # the DPL base loss only consumes YS / LABELS
    ys = out_dict["YS"]                             # (B, C), native dtype on the wire
    labels = out_dict["LABELS"].astype(jnp.int32)   # (B,)
    B, C = ys.shape

    if not force_pallas and B <= _SMALL_BATCH_FASTPATH:
        # For realistic AddMNIST batches, kernel launch + one tiny DMA dominates;
        # plain jnp (ideally fused into the YS producer) is the honest optimum.
        loss = _nll_mean_ref(ys, labels)
        return loss, {"y-loss": loss}

    # Class-major (lane-dense) layout: batch on the 128-lane axis.
    # TODO(synk): have the YS producer emit (C, B) directly so this transpose is free.
    ys_cm = ys.T                                    # (C, B)
    labels_row = labels.reshape(1, B)               # (1, B)

    if tile_cols is None:
        tile_cols = _DEFAULT_TILE_COLS
    if B <= tile_cols:
        tb = B                                      # single full-extent block
    else:
        tb = max((tile_cols // 128) * 128, 128)     # lane-dense tile (multiple of 128)

    tiles_total = pl.cdiv(B, tb)
    tail_cols = B % tb                              # 0 => every tile is full
    last_tile = tiles_total - 1
    # v7x: shard the batch tiles across both TensorCores when they split evenly
    # (keeps every index-map block in range; odd tile counts fall back to 1 shard).
    num_cores = 2 if (tiles_total >= 2 and tiles_total % 2 == 0) else 1
    tiles_per_core = tiles_total // num_cores

    kernel = functools.partial(
        _dpl_nll_kernel,
        tiles_per_core=tiles_per_core, last_tile=last_tile, tail_cols=tail_cols)

    cost = pl.CostEstimate(
        flops=6 * B * C,
        transcendentals=B * C,
        bytes_accessed=B * C * ys.dtype.itemsize + B * 4 + num_cores * 8 * 128 * 4)

    partials = pl.pallas_call(
        kernel,
        out_shape=jax.ShapeDtypeStruct((num_cores * 8, 128), jnp.float32),
        grid=(num_cores, tiles_per_core),
        in_specs=[
            # (C, TB): C equals the full (sublane) dim; TB is the full batch or
            # a multiple of 128 on the lane dim -> (8, 128) rule satisfied.
            pl.BlockSpec((C, tb), lambda ci, ti: (0, ci * tiles_per_core + ti)),
            pl.BlockSpec((1, tb), lambda ci, ti: (0, ci * tiles_per_core + ti)),
        ],
        out_specs=pl.BlockSpec((8, 128), lambda ci, ti: (ci, 0)),
        scratch_shapes=[pltpu.VMEM((C, tb), jnp.float32)],
        compiler_params=pltpu.CompilerParams(
            dimension_semantics=("parallel", "arbitrary")),
        cost_estimate=cost,
    )(ys_cm, labels_row)

    loss = -jnp.sum(partials[::8, 0]) * (1.0 / float(B))
    losses = {"y-loss": loss}
    return loss, losses


if __name__ == "__main__":
    key = jax.random.PRNGKey(0)
    k1, k2, k3, k4, k5, k6 = jax.random.split(key, 6)

    # Case 1: tiny f32 batch, single full-extent tile, single core shard.
    B1 = 8
    logits1 = jax.random.normal(k1, (B1, NR_CLASSES), dtype=jnp.float32)
    ys1 = jax.nn.softmax(logits1, axis=-1)
    labels1 = jax.random.randint(k2, (B1,), 0, NR_CLASSES, dtype=jnp.int32)
    loss1, losses1 = addmnist_dpl_forward(
        {"YS": ys1, "LABELS": labels1}, force_pallas=True)
    loss1 = jax.block_until_ready(loss1)
    ref1 = jax.block_until_ready(_nll_mean_ref(ys1, labels1))
    assert jnp.allclose(loss1, ref1, atol=1e-4, rtol=1e-4), (loss1, ref1)
    assert "y-loss" in losses1

    # Case 2: bf16 probabilities (native dtype on the wire), 4 tiles split
    # across 2 core shards, partial last tile (exercises tail masking).
    B2 = 428
    logits2 = jax.random.normal(k3, (B2, NR_CLASSES), dtype=jnp.float32)
    ys2 = jax.nn.softmax(logits2, axis=-1).astype(jnp.bfloat16)
    labels2 = jax.random.randint(k4, (B2,), 0, NR_CLASSES, dtype=jnp.int32)
    loss2, _ = addmnist_dpl_forward(
        {"YS": ys2, "LABELS": labels2}, tile_cols=128, force_pallas=True)
    loss2 = jax.block_until_ready(loss2)
    ref2 = jax.block_until_ready(_nll_mean_ref(ys2, labels2))
    assert jnp.allclose(loss2, ref2, atol=1e-4, rtol=1e-4), (loss2, ref2)

    # Case 3: odd tile count (falls back to a single core shard) with a tail.
    B3 = 300
    logits3 = jax.random.normal(k5, (B3, NR_CLASSES), dtype=jnp.float32)
    ys3 = jax.nn.softmax(logits3, axis=-1)
    labels3 = jax.random.randint(k6, (B3,), 0, NR_CLASSES, dtype=jnp.int32)
    loss3, _ = addmnist_dpl_forward(
        {"YS": ys3, "LABELS": labels3}, tile_cols=128, force_pallas=True)
    loss3 = jax.block_until_ready(loss3)
    ref3 = jax.block_until_ready(_nll_mean_ref(ys3, labels3))
    assert jnp.allclose(loss3, ref3, atol=1e-4, rtol=1e-4), (loss3, ref3)

    # Case 4: small-batch fast path (no kernel launch).
    loss4, _ = addmnist_dpl_forward({"YS": ys1, "LABELS": labels1})
    loss4 = jax.block_until_ready(loss4)
    assert jnp.allclose(loss4, ref1, atol=1e-6, rtol=1e-6), (loss4, ref1)

    print("KERNEL_OK")
</pallas_src>

<mosaic_0001>
module attributes {stable_mosaic.version = 11 : i64} {
  func.func @_dpl_nll_kernel(%arg0: i32, %arg1: i32, %arg2: memref<9x8xf32, #tpu.memory_space<vmem>>, %arg3: memref<1x8xi32, #tpu.memory_space<vmem>>, %arg4: memref<8x128xf32, #tpu.memory_space<vmem>>, %arg5: memref<9x8xf32, #tpu.memory_space<vmem>>) attributes {dimension_semantics = [#tpu.dimension_semantics<parallel>, #tpu.dimension_semantics<arbitrary>], iteration_bounds = array<i64: 1, 1>, scalar_prefetch = 0 : i64, scratch_operands = 1 : i64, tpu.core_type = #tpu.core_type<tc>, window_params = [{transform_indices = @transform_0, window_bounds = array<i64: 9, 8>}, {transform_indices = @transform_1, window_bounds = array<i64: 1, 8>}, {transform_indices = @transform_2, window_bounds = array<i64: 8, 128>}]} {
    %c0_i32 = arith.constant 0 : i32
    %0 = arith.cmpi eq, %arg1, %c0_i32 : i32
    %1 = arith.extui %0 : i1 to i32
    %c0_i32_0 = arith.constant 0 : i32
    %2 = arith.cmpi ne, %1, %c0_i32_0 : i32
    scf.if %2 {
      %cst_10 = arith.constant 0.000000e+00 : f32
      %17 = vector.broadcast %cst_10 : f32 to vector<9x8xf32>
      %c0_11 = arith.constant 0 : index
      %c0_12 = arith.constant 0 : index
      %18 = vector.load %arg5[%c0_11, %c0_12] : memref<9x8xf32, #tpu.memory_space<vmem>>, vector<9x8xf32>
      tpu.vector_store %arg5[%c0_11, %c0_12], %17 {strides = array<i32>} : memref<9x8xf32, #tpu.memory_space<vmem>>, vector<9x8xf32>,
    } else {
    }
    %c0 = arith.constant 0 : index
    %c0_1 = arith.constant 0 : index
    %3 = vector.load %arg2[%c0, %c0_1] : memref<9x8xf32, #tpu.memory_space<vmem>>, vector<9x8xf32>
    %c0_2 = arith.constant 0 : index
    %c0_3 = arith.constant 0 : index
    %4 = vector.load %arg3[%c0_2, %c0_3] : memref<1x8xi32, #tpu.memory_space<vmem>>, vector<1x8xi32>
    %5 = tpu.iota {dimensions = array<i32: 0>} : vector<9x8xi32>
    %6 = vector.broadcast %4 : vector<1x8xi32> to vector<9x8xi32>
    %7 = arith.cmpi eq, %5, %6 : vector<9x8xi32>
    %8 = math.log %3 : vector<9x8xf32>
    %c0_4 = arith.constant 0 : index
    %c0_5 = arith.constant 0 : index
    %9 = vector.load %arg5[%c0_4, %c0_5] : memref<9x8xf32, #tpu.memory_space<vmem>>, vector<9x8xf32>
    %cst = arith.constant 0.000000e+00 : f32
    %10 = vector.broadcast %cst : f32 to vector<9x8xf32>
    %11 = arith.select %7, %8, %10 : vector<9x8xi1>, vector<9x8xf32>
    %12 = arith.addf %9, %11 : vector<9x8xf32>
    %c0_6 = arith.constant 0 : index
    %c0_7 = arith.constant 0 : index
    %13 = vector.load %arg5[%c0_6, %c0_7] : memref<9x8xf32, #tpu.memory_space<vmem>>, vector<9x8xf32>
    tpu.vector_store %arg5[%c0_6, %c0_7], %12 {strides = array<i32>} : memref<9x8xf32, #tpu.memory_space<vmem>>, vector<9x8xf32>,
    %c0_i32_8 = arith.constant 0 : i32
    %14 = arith.cmpi eq, %arg1, %c0_i32_8 : i32
    %15 = arith.extui %14 : i1 to i32
    %c0_i32_9 = arith.constant 0 : i32
    %16 = arith.cmpi ne, %15, %c0_i32_9 : i32
    scf.if %16 {
      %c0_10 = arith.constant 0 : index
      %c0_11 = arith.constant 0 : index
      %17 = vector.load %arg5[%c0_10, %c0_11] : memref<9x8xf32, #tpu.memory_space<vmem>>, vector<9x8xf32>
      %18 = vector.shape_cast %17 : vector<9x8xf32> to vector<1x9x8xf32>
      %cst_12 = arith.constant dense<0.000000e+00> : vector<1xf32>
      %19 = vector.multi_reduction <add>, %18, %cst_12 [1, 2] : vector<1x9x8xf32> to vector<1xf32>
      %20 = vector.shape_cast %19 : vector<1xf32> to vector<1x1x1xf32>
      %21 = vector.extract %20[0, 0, 0] : f32 from vector<1x1x1xf32>
      %22 = vector.broadcast %21 : f32 to vector<8x128xf32>
      %c0_13 = arith.constant 0 : index
      %c0_14 = arith.constant 0 : index
      %23 = vector.load %arg4[%c0_13, %c0_14] : memref<8x128xf32, #tpu.memory_space<vmem>>, vector<8x128xf32>
      tpu.vector_store %arg4[%c0_13, %c0_14], %22 {strides = array<i32>} : memref<8x128xf32, #tpu.memory_space<vmem>>, vector<8x128xf32>,
    } else {
    }
    return
  }
  func.func @transform_0(%arg0: i32, %arg1: i32) -> (i32, i32) {
    %c1_i32 = arith.constant 1 : i32
    %0 = arith.muli %arg0, %c1_i32 : i32
    %1 = arith.addi %0, %arg1 : i32
    %c0_i32 = arith.constant 0 : i32
    %c0_i32_0 = arith.constant 0 : i32
    return %c0_i32, %1 : i32, i32
  }
  func.func @transform_1(%arg0: i32, %arg1: i32) -> (i32, i32) {
    %c1_i32 = arith.constant 1 : i32
    %0 = arith.muli %arg0, %c1_i32 : i32
    %1 = arith.addi %0, %arg1 : i32
    %c0_i32 = arith.constant 0 : i32
    %c0_i32_0 = arith.constant 0 : i32
    return %c0_i32, %1 : i32, i32
  }
  func.func @transform_2(%arg0: i32, %arg1: i32) -> (i32, i32) {
    %c0_i32 = arith.constant 0 : i32
    %c0_i32_0 = arith.constant 0 : i32
    return %arg0, %c0_i32 : i32, i32
  }
}

</mosaic_0001>

<bundles_post_ra>
// kernel: tpu_custom_call.1
= control target key start
LH: loop header
LB: loop body
LE: loop exit
PB: predicated region body
PF: predicated region fallthrough
CT: control target
= control target key end

     0   :  { %vm47_vm0 = vcmask 64512   ;;  %vm49_vm1 = vcmask 57344   ;;  %v54_v2 = vlaneseq  ;;  %v152_v3 = vmov 0.0   ;;  %s196_s0 = inlined_call_operand.vmem [shape: f32[9,8], index: 0, kind: input, shape index: {}]   ;;  %s197_s1 = inlined_call_operand.vmem [shape: s32[1,8], index: 1, kind: input, shape index: {}]   ;;  %s198_s2 = inlined_call_operand.hbm [shape: f32[8,128], index: 2, kind: output, shape index: {}]  }
   0x1   :  { %v51_v0 = vld [vmem:[%s196_s0] sm:$0xff]  ;;  %v52_v1 = vld [vmem:[%s196_s0 + $0x8] sm:$0x1]  ;;  %48 = vst.msk [vmem:[#allocation2] sm:$0xff] %vm47_vm0, %v152_v3 }
   0x2   :  { %50 = vst.msk [vmem:[#allocation2 + $0x8] sm:$0x1] %vm49_vm1, %v152_v3  ;;  %124 = vlog2.f32 %v51_v0 }
   0x3   :  { %7 = vsyncpa [#allocation4], 0  ;;  %126 = vlog2.f32 %v52_v1  ;;  %v55_v4 = vshrl.u32 %v54_v2, 7  ;;  %v119_v5 = vld [vmem:[%s197_s1] ss:$0 sm:$0xff]  ;;  %s153_s0 = smov [#allocation3]  }
   0x4   :  { %s102_s1 = sshll.u32 %s153_s0, 4  ;;  %s103_s1 = int_to_ptr.vmem [resolvable:$true] %s102_s1 }
   0x5   :  { %v56_v6 = vadd.s32 8, %v55_v4  ;;  %vm61_vm2 = vcmp.eq.s32.totalorder %v55_v4, %v119_v5  ;;  %s128_s16 = scalar_lea.vmem %s103_s1, 128  ;;  %p133_p1 = scmp.lt.s32.totalorder %s103_s1, %s103_s1 }
   0x6   :  { %p129_p0 = scmp.ne.s32.totalorder %s103_s1, %s128_s16  ;;  %p134_p2 = scmp.lt.s32.totalorder %s128_s16, %s128_s16 }
   0x7   :  { %vm62_vm3 = vcmp.eq.s32.totalorder %v56_v6, %v119_v5 }
   0x8   :  { %v67_v10 = vld [vmem:[#allocation2] sm:$0xff]  ;;  %p135_p3 = por %p134_p2, %p133_p1 }
   0x9   :  { %v68_v12 = vld [vmem:[#allocation2 + $0x8] sm:$0x1] }
   0xa   :  { %p136_p4 = pnand %p135_p3, %p129_p0 }
   0xc   :  { %v125_v7 = vpop.eup %124 }
   0xd   :  { %v127_v8 = vpop.eup %126  ;;  %v64_v9 = vmul.f32 0.6931472, %v125_v7 }
   0xe   :  { %v66_v11 = vmul.f32 0.6931472, %v127_v8 }
   0xf   :  { %v69_v13 = vsel %vm61_vm2, %v64_v9, 0.0 }
  0x10   :  { %v70_v14 = vsel %vm62_vm3, %v66_v11, 0.0  ;;  %v71_v15 = vadd.f32 %v69_v13, %v67_v10 }
  0x11   :  { %v72_v16 = vadd.f32 %v70_v14, %v68_v12 }
  0x12   :  { %74 = vst.msk [vmem:[#allocation2] sm:$0xff] %vm47_vm0, %v71_v15 }
  0x13   :  { %76 = vst.msk [vmem:[#allocation2 + $0x8] sm:$0x1] %vm49_vm1, %v72_v16 }
  0x19   :  { %v80_v17 = vld [vmem:[#allocation2] sm:$0xff] }
  0x1a   :  { %v81_v18 = vld [vmem:[#allocation2 + $0x8] sm:$0x1]  ;;  %v82_v19 = vsel %vm47_vm0, %v80_v17, 0.0 }
  0x1b   :  { %v83_v20 = vsel %vm49_vm1, %v81_v18, 0.0 }
  0x1c   :  { %v84_v21 = vadd.f32 %v83_v20, %v82_v19 }
  0x1e   :  { %85 = vadd.xlane.f32.xlu0 %v84_v21 }
  0xab   :  { %v86_v22 = vpop.xlane.xlu0 %85 }
  0xac   :  { %v87_v23 = vrot.slane %v86_v22, 4 }
  0xae   :  { %v88_v24 = vadd.f32 %v87_v23, %v86_v22 }
  0xb0   :  { %v89_v25 = vrot.slane %v88_v24, 2 }
  0xb2   :  { %v90_v26 = vadd.f32 %v89_v25, %v88_v24 }
  0xb4   :  { %v91_v27 = vrot.slane %v90_v26, 1 }
  0xb6   :  { %v92_v28 = vadd.f32 %v91_v27, %v90_v26 }
  0xb8   :  { %120 = vpush %v92_v28 }
  0xe9   :  { %s121_s15 = spop %120 }
  0xea   :  { %v94_v29 = vstv %s121_s15 }
  0xeb   :  { %95 = vst [vmem:[#allocation3] sm:$0xff] %v94_v29 }
  0xec   :  { %139 = shalt.err (!%p136_p4)
}
  0xed   :  { %s140_s19 = scalar_lea.hbm %s198_s2, 128 }
  0xee   :  { %p141_p5 = scmp.ne.s32.totalorder %s198_s2, %s140_s19  ;;  %p144_p6 = scmp.lt.u32.totalorder %s140_s19, %s198_s2 }
  0xf0   :  { %p146_p7 = pnand %p144_p6, %p141_p5 }
  0xf2   :  { %149 = shalt.err (!%p146_p7)
}
  0xf3   :  { %105 = dma.vmem_to_hbm [thread:$0]  %s103_s1, 128, %s198_s2, [#allocation4]  }
  0xf4   :  { %150 = dma.done.wait [#allocation4], 128  }
  0xf5   :  { %151 = vsyncadd [#allocation4], 4294967168 }
  0xf6   :  { %109 = vsyncpa [#allocation4], 1 }

</bundles_post_ra>
